<compile_context>
chip_gen: v7x
topology: tpu7x:2x2x1
jax: 0.10.0
libtpu: 0.0.40
codegen_flags: <defaults>
</compile_context>

<pallas_src>
import jax
import jax.numpy as jnp
import numpy as np
from jax import lax
from jax.experimental import pallas as pl
from jax.experimental.pallas import tpu as pltpu


def gcn_kernel(feat_ref, tgt_ref, src_ref, w_ref, b_ref, out_ref, adj_ref):
    """Grid = (edge_chunk,).

    feat_ref : (1, N)       f32  batch-0 node features
    tgt_ref  : (1, E_T)     i32  edge targets for this chunk (lane-dense)
    src_ref  : (1, E_T)     i32  edge sources for this chunk (lane-dense)
    w_ref    : (N, C)       f32  fc weight, pre-transposed
    b_ref    : (1, C)       f32  fc bias
    out_ref  : (B, C)       f32  row 0 = real result, rows 1.. = bias only
    adj_ref  : (N, N) f32 scratch: adjacency-count accumulator A[src, tgt]
    """
    chunk = pl.program_id(0)
    last_chunk = pl.num_programs(0) - 1

    n_nodes = feat_ref.shape[1]
    e_tile = src_ref.shape[1]

    @pl.when(chunk == 0)
    def _init():
        adj_ref[...] = jnp.zeros_like(adj_ref)

    # One-hots: nodes on sublanes, edges on lanes.  The lane-dense index rows
    # broadcast over the sublane node iota; padded edges (id = -1) match no node
    # and thus contribute nothing to A (and hence nothing to the degree).
    node_iota = lax.broadcasted_iota(jnp.int32, (n_nodes, e_tile), 0)
    src_onehot = (node_iota == src_ref[...]).astype(jnp.bfloat16)   # (N, E_T)
    tgt_onehot = (node_iota == tgt_ref[...]).astype(jnp.bfloat16)   # (N, E_T)

    # A[m, n] += sum_e src_onehot[m, e] * tgt_onehot[n, e]
    # Lane-axis contraction on the MXU; bf16 0/1 operands + f32 accumulation is
    # exact (pure counts).
    adj_ref[...] += lax.dot_general(
        src_onehot, tgt_onehot,
        dimension_numbers=(((1,), (1,)), ((), ())),
        preferred_element_type=jnp.float32)

    @pl.when(chunk == last_chunk)
    def _finalize():
        adj = adj_ref[...]                               # (N, N) exact edge counts
        # deg[n] = #edges targeting n = column-sum of A (XLU sublane reduction).
        deg = jnp.sum(adj, axis=0, keepdims=True)        # (1, N)
        # Every node appears as a target (compute_degree asserts this on the
        # host), so deg > 0 and rsqrt stays finite.
        dinv = lax.rsqrt(deg)                            # (1, N)
        feat_s = feat_ref[...] * dinv                    # (1, N) f32
        # agg[n] = sum_m feat_s[m] * A[m, n]; one-time finalize matvec in f32.
        agg = jnp.dot(feat_s, adj, preferred_element_type=jnp.float32)
        agg_s = agg * dinv                               # (1, N)
        row0 = jnp.dot(agg_s, w_ref[...],
                       preferred_element_type=jnp.float32) + b_ref[...]   # (1, C)
        # torch scatter_add_ with a batch-extent-1 index only fills batch 0;
        # every other batch row is just the bias.
        n_batch, n_class = out_ref.shape
        row_id = lax.broadcasted_iota(jnp.int32, (n_batch, n_class), 0)
        out_ref[...] = jnp.where(
            row_id == 0,
            jnp.broadcast_to(row0, (n_batch, n_class)),
            jnp.broadcast_to(b_ref[...], (n_batch, n_class)))


def gcn_forward(nodes_feat_list, edges_index_list, graph_label_list, fc_w, fc_b,
                *, edge_tile=512):
    """nodes_feat_list : (B, N, 1) f32
       edges_index_list: (Bg, 2, E) i32  (only batch 0 of the edge list is used,
                                          exactly like the PyTorch forward)
       graph_label_list: unused by the forward pass
       fc_w: (C, N) f32, fc_b: (C,) f32
       edge_tile: edges per grid step (multiple of 128; use a multiple of 256 on
                  v6e/v7x to fill the 256-deep MXU contraction).
       returns: (B, 1, C) f32
    """
    del graph_label_list  # not used by the forward pass
    assert edge_tile % 128 == 0
    B, N, F = nodes_feat_list.shape
    assert F == 1, "aggregate_neighbors only supports a single feature per node"
    C = fc_w.shape[0]

    # Edge preprocessing (padding, layout, asserts) is host-side on concrete edge
    # data -> the edge list must be static (not traced); mirrors the PyTorch
    # compute_degree assert so rsqrt(0) can never happen inside the kernel.
    edges = np.asarray(edges_index_list[0]).astype(np.int32)      # (2, E)
    E = edges.shape[1]
    assert E >= N, "torch slices the scatter output [:, 0:N]; needs E >= N"
    assert np.unique(edges[0]).shape[0] == N, "degree must cover all nodes"

    # Only batch 0 is actually scattered by the torch code -> only it enters the
    # matmul chain; other batches get the bias row written directly in-kernel.
    feat0 = jnp.asarray(nodes_feat_list[0:1, :, 0], jnp.float32)  # (1, N)

    # Pad the edge axis to a multiple of edge_tile with an invalid node id (-1):
    # padded edges match no node, so they add nothing to A or the degree.
    n_chunks = int(pl.cdiv(E, edge_tile))
    e_pad = n_chunks * edge_tile
    tgt = np.full((1, e_pad), -1, np.int32)
    src = np.full((1, e_pad), -1, np.int32)
    tgt[0, :E] = edges[0]
    src[0, :E] = edges[1]
    tgt_row = jnp.asarray(tgt)                                    # (1, E_pad)
    src_row = jnp.asarray(src)                                    # (1, E_pad)

    w_t = jnp.asarray(fc_w, jnp.float32).T                        # (N, C)
    b2 = jnp.asarray(fc_b, jnp.float32).reshape(1, C)

    # VMEM budget from actual buffer arithmetic (adjacency scratch +
    # double-buffered I/O blocks + in-flight one-hot / iota temporaries), with
    # generous headroom; clamped so it stays valid on v7x's 64 MiB VMEM.
    io_block_bytes = 4 * (N + 2 * edge_tile + N * C + C + B * C)
    temp_bytes = 6 * N * edge_tile * 4
    vmem_bytes = N * N * 4 + 2 * io_block_bytes + temp_bytes
    vmem_limit = int(min(max(2 * vmem_bytes + (4 << 20), 16 << 20), 48 << 20))

    cost = pl.CostEstimate(
        flops=int(2 * N * e_pad * N + 2 * N * N + 2 * N * C),
        transcendentals=int(N),
        bytes_accessed=int(4 * (N + 2 * e_pad + N * C + C + B * C)),
    )

    # TODO(synk): on v7x, add a leading "parallel" grid axis over edge halves with
    # per-core partial adjacency accumulators (combined in finalize) to use both
    # TensorCores; not worthwhile at these toy shapes.
    # TODO(synk): if DMA latency is exposed at very large E, add
    # pipeline_mode=pl.Buffered(3) on the tgt/src BlockSpecs (blocks are a few KiB).
    out2d = pl.pallas_call(
        gcn_kernel,
        out_shape=jax.ShapeDtypeStruct((B, C), jnp.float32),
        grid_spec=pltpu.PrefetchScalarGridSpec(
            num_scalar_prefetch=0,
            grid=(n_chunks,),
            in_specs=[
                pl.BlockSpec((1, N), lambda c: (0, 0)),            # feat (batch 0)
                pl.BlockSpec((1, edge_tile), lambda c: (0, c)),    # tgt row (lane-dense)
                pl.BlockSpec((1, edge_tile), lambda c: (0, c)),    # src row (lane-dense)
                pl.BlockSpec((N, C), lambda c: (0, 0)),            # W^T
                pl.BlockSpec((1, C), lambda c: (0, 0)),            # bias
            ],
            out_specs=pl.BlockSpec((B, C), lambda c: (0, 0)),
            scratch_shapes=[
                pltpu.VMEM((N, N), jnp.float32),                   # adjacency accumulator
            ],
        ),
        compiler_params=pltpu.CompilerParams(
            dimension_semantics=("arbitrary",),
            vmem_limit_bytes=vmem_limit,
        ),
        cost_estimate=cost,
    )(feat0, tgt_row, src_row, w_t, b2)

    return out2d.reshape(B, 1, C)


def gcn_reference(nodes_feat_list, edges_index_list, fc_w, fc_b):
    """Pure-JAX f32 reference mirroring the PyTorch forward (incl. the
    batch-0-only scatter_add_ quirk)."""
    B, N, _ = nodes_feat_list.shape
    feat = nodes_feat_list[..., 0].astype(jnp.float32)            # (B, N)
    edges = edges_index_list[0]
    tgt, src = edges[0], edges[1]
    E = tgt.shape[0]
    deg = jnp.zeros((N,), jnp.float32).at[tgt].add(1.0)
    dinv = deg ** -0.5
    feat_s = feat * dinv[None, :]
    gathered = feat_s[:, src]                                     # (B, E)
    agg = jnp.zeros((B, E), jnp.float32).at[0, tgt].add(gathered[0])
    agg = agg[:, :N]
    agg_s = agg * dinv[None, :]
    out = agg_s @ fc_w.T + fc_b
    return out[:, None, :]


if __name__ == "__main__":
    B, N, C = 2, 16, 8
    key = jax.random.PRNGKey(0)
    k_feat, k_w, k_b = jax.random.split(key, 3)

    nodes_feat_list = jax.random.normal(k_feat, (B, N, 1), dtype=jnp.float32)

    # Dense directed toy graph: one edge (target=i, source=j) for every ordered
    # pair i != j  ->  E = N*(N-1) = 240, every node is a target (degree = N-1),
    # so the PyTorch degree assert holds.
    ii, jj = np.meshgrid(np.arange(N, dtype=np.int32),
                         np.arange(N, dtype=np.int32), indexing="ij")
    keep = ii != jj
    edges_one = np.stack([ii[keep], jj[keep]], axis=0)            # (2, 240)
    edges_index_list = jnp.asarray(
        np.broadcast_to(edges_one, (B, 2, edges_one.shape[1])).copy(),
        dtype=jnp.int32)

    graph_label_list = jnp.zeros((B,), jnp.int32)                 # unused by forward

    # Deterministic nn.Linear(N, C)-style parameters.
    bound = 1.0 / (N ** 0.5)
    fc_w = jax.random.uniform(k_w, (C, N), jnp.float32, -bound, bound)
    fc_b = jax.random.uniform(k_b, (C,), jnp.float32, -bound, bound)

    ref = gcn_reference(nodes_feat_list, edges_index_list, fc_w, fc_b)

    # Default edge_tile=512 -> single edge chunk (E=240 pads to 512).
    out = gcn_forward(nodes_feat_list, edges_index_list, graph_label_list,
                      fc_w, fc_b)
    out = jax.block_until_ready(out)
    assert out.shape == (B, 1, C), out.shape
    # Batches > 0 only receive the bias (torch scatter_add_ batch-0 quirk): exact.
    assert jnp.allclose(out[1:], jnp.broadcast_to(fc_b, (B - 1, 1, C)),
                        atol=1e-6), out[1:]
    assert jnp.allclose(out, ref, atol=2e-2, rtol=2e-2), (out, ref)

    # edge_tile=128 -> two edge chunks, exercising the multi-chunk adjacency
    # accumulation path (128 is fine for a small-E correctness check).
    out_mc = gcn_forward(nodes_feat_list, edges_index_list, graph_label_list,
                         fc_w, fc_b, edge_tile=128)
    out_mc = jax.block_until_ready(out_mc)
    assert jnp.allclose(out_mc, ref, atol=2e-2, rtol=2e-2), (out_mc, ref)

    print("KERNEL_OK")
</pallas_src>

<mosaic_0001>
module attributes {stable_mosaic.version = 11 : i64} {
  func.func @gcn_kernel(%arg0: i32, %arg1: memref<1x16xf32, #tpu.memory_space<vmem>>, %arg2: memref<1x512xi32, #tpu.memory_space<vmem>>, %arg3: memref<1x512xi32, #tpu.memory_space<vmem>>, %arg4: memref<16x8xf32, #tpu.memory_space<vmem>>, %arg5: memref<1x8xf32, #tpu.memory_space<vmem>>, %arg6: memref<2x8xf32, #tpu.memory_space<vmem>>, %arg7: memref<16x16xf32, #tpu.memory_space<vmem>>) attributes {dimension_semantics = [#tpu.dimension_semantics<arbitrary>], iteration_bounds = array<i64: 1>, scalar_prefetch = 0 : i64, scratch_operands = 1 : i64, tpu.core_type = #tpu.core_type<tc>, window_params = [{pipeline_mode = #tpu.pipeline_mode<synchronous>, transform_indices = @transform_0, window_bounds = array<i64: 1, 16>}, {transform_indices = @transform_1, window_bounds = array<i64: 1, 512>}, {transform_indices = @transform_2, window_bounds = array<i64: 1, 512>}, {pipeline_mode = #tpu.pipeline_mode<synchronous>, transform_indices = @transform_3, window_bounds = array<i64: 16, 8>}, {pipeline_mode = #tpu.pipeline_mode<synchronous>, transform_indices = @transform_4, window_bounds = array<i64: 1, 8>}, {pipeline_mode = #tpu.pipeline_mode<synchronous>, transform_indices = @transform_5, window_bounds = array<i64: 2, 8>}]} {
    %c0_i32 = arith.constant 0 : i32
    %0 = arith.cmpi eq, %arg0, %c0_i32 : i32
    %1 = arith.extui %0 : i1 to i32
    %c0_i32_0 = arith.constant 0 : i32
    %2 = arith.cmpi ne, %1, %c0_i32_0 : i32
    scf.if %2 {
      %cst_10 = arith.constant 0.000000e+00 : f32
      %23 = vector.broadcast %cst_10 : f32 to vector<16x16xf32>
      %c0_11 = arith.constant 0 : index
      %c0_12 = arith.constant 0 : index
      %24 = vector.load %arg7[%c0_11, %c0_12] : memref<16x16xf32, #tpu.memory_space<vmem>>, vector<16x16xf32>
      tpu.vector_store %arg7[%c0_11, %c0_12], %23 {strides = array<i32>} : memref<16x16xf32, #tpu.memory_space<vmem>>, vector<16x16xf32>,
    } else {
    }
    %3 = tpu.iota {dimensions = array<i32: 0>} : vector<16x512xi32>
    %c0 = arith.constant 0 : index
    %c0_1 = arith.constant 0 : index
    %4 = vector.load %arg3[%c0, %c0_1] : memref<1x512xi32, #tpu.memory_space<vmem>>, vector<1x512xi32>
    %5 = vector.broadcast %4 : vector<1x512xi32> to vector<16x512xi32>
    %6 = arith.cmpi eq, %3, %5 : vector<16x512xi32>
    %7 = arith.extui %6 : vector<16x512xi1> to vector<16x512xi32>
    %8 = arith.sitofp %7 : vector<16x512xi32> to vector<16x512xf32>
    %9 = arith.truncf %8 : vector<16x512xf32> to vector<16x512xbf16>
    %c0_2 = arith.constant 0 : index
    %c0_3 = arith.constant 0 : index
    %10 = vector.load %arg2[%c0_2, %c0_3] : memref<1x512xi32, #tpu.memory_space<vmem>>, vector<1x512xi32>
    %11 = vector.broadcast %10 : vector<1x512xi32> to vector<16x512xi32>
    %12 = arith.cmpi eq, %3, %11 : vector<16x512xi32>
    %13 = arith.extui %12 : vector<16x512xi1> to vector<16x512xi32>
    %14 = arith.sitofp %13 : vector<16x512xi32> to vector<16x512xf32>
    %15 = arith.truncf %14 : vector<16x512xf32> to vector<16x512xbf16>
    %c0_4 = arith.constant 0 : index
    %c0_5 = arith.constant 0 : index
    %16 = vector.load %arg7[%c0_4, %c0_5] : memref<16x16xf32, #tpu.memory_space<vmem>>, vector<16x16xf32>
    %cst = arith.constant dense<0.000000e+00> : vector<16x16xf32>
    %17 = tpu.matmul %9, %15, %cst {dimension_numbers = #tpu.dot_dimension_numbers<[1], [1], [0], [0], [0, 0, 1, 0], [], []>} : vector<16x512xbf16>, vector<16x512xbf16>, vector<16x16xf32> -> vector<16x16xf32>
    %18 = arith.addf %16, %17 : vector<16x16xf32>
    %c0_6 = arith.constant 0 : index
    %c0_7 = arith.constant 0 : index
    %19 = vector.load %arg7[%c0_6, %c0_7] : memref<16x16xf32, #tpu.memory_space<vmem>>, vector<16x16xf32>
    tpu.vector_store %arg7[%c0_6, %c0_7], %18 {strides = array<i32>} : memref<16x16xf32, #tpu.memory_space<vmem>>, vector<16x16xf32>,
    %c0_i32_8 = arith.constant 0 : i32
    %20 = arith.cmpi eq, %arg0, %c0_i32_8 : i32
    %21 = arith.extui %20 : i1 to i32
    %c0_i32_9 = arith.constant 0 : i32
    %22 = arith.cmpi ne, %21, %c0_i32_9 : i32
    scf.if %22 {
      %c0_10 = arith.constant 0 : index
      %c0_11 = arith.constant 0 : index
      %23 = vector.load %arg7[%c0_10, %c0_11] : memref<16x16xf32, #tpu.memory_space<vmem>>, vector<16x16xf32>
      %cst_12 = arith.constant dense<0.000000e+00> : vector<16xf32>
      %24 = vector.multi_reduction <add>, %23, %cst_12 [0] : vector<16x16xf32> to vector<16xf32>
      %25 = vector.shape_cast %24 : vector<16xf32> to vector<1x16xf32>
      %26 = math.rsqrt %25 : vector<1x16xf32>
      %c0_13 = arith.constant 0 : index
      %c0_14 = arith.constant 0 : index
      %27 = vector.load %arg1[%c0_13, %c0_14] : memref<1x16xf32, #tpu.memory_space<vmem>>, vector<1x16xf32>
      %28 = arith.mulf %27, %26 : vector<1x16xf32>
      %cst_15 = arith.constant dense<0.000000e+00> : vector<1x16xf32>
      %29 = tpu.matmul %28, %23, %cst_15 {dimension_numbers = #tpu.dot_dimension_numbers<[1], [0], [0], [1], [0, 0, 1, 1], [], []>} : vector<1x16xf32>, vector<16x16xf32>, vector<1x16xf32> -> vector<1x16xf32>
      %30 = arith.mulf %29, %26 : vector<1x16xf32>
      %c0_16 = arith.constant 0 : index
      %c0_17 = arith.constant 0 : index
      %31 = vector.load %arg4[%c0_16, %c0_17] : memref<16x8xf32, #tpu.memory_space<vmem>>, vector<16x8xf32>
      %cst_18 = arith.constant dense<0.000000e+00> : vector<1x8xf32>
      %32 = tpu.matmul %30, %31, %cst_18 {dimension_numbers = #tpu.dot_dimension_numbers<[1], [0], [0], [1], [0, 0, 1, 1], [], []>} : vector<1x16xf32>, vector<16x8xf32>, vector<1x8xf32> -> vector<1x8xf32>
      %c0_19 = arith.constant 0 : index
      %c0_20 = arith.constant 0 : index
      %33 = vector.load %arg5[%c0_19, %c0_20] : memref<1x8xf32, #tpu.memory_space<vmem>>, vector<1x8xf32>
      %34 = arith.addf %32, %33 : vector<1x8xf32>
      %35 = tpu.iota {dimensions = array<i32: 0>} : vector<2x8xi32>
      %c0_i32_21 = arith.constant 0 : i32
      %36 = vector.broadcast %c0_i32_21 : i32 to vector<2x8xi32>
      %37 = arith.cmpi eq, %35, %36 : vector<2x8xi32>
      %38 = vector.shape_cast %34 : vector<1x8xf32> to vector<1x8xf32>
      %39 = vector.broadcast %38 : vector<1x8xf32> to vector<2x8xf32>
      %c0_22 = arith.constant 0 : index
      %c0_23 = arith.constant 0 : index
      %40 = vector.load %arg5[%c0_22, %c0_23] : memref<1x8xf32, #tpu.memory_space<vmem>>, vector<1x8xf32>
      %41 = vector.shape_cast %40 : vector<1x8xf32> to vector<1x8xf32>
      %42 = vector.broadcast %41 : vector<1x8xf32> to vector<2x8xf32>
      %43 = arith.select %37, %39, %42 : vector<2x8xi1>, vector<2x8xf32>
      %c0_24 = arith.constant 0 : index
      %c0_25 = arith.constant 0 : index
      %44 = vector.load %arg6[%c0_24, %c0_25] : memref<2x8xf32, #tpu.memory_space<vmem>>, vector<2x8xf32>
      tpu.vector_store %arg6[%c0_24, %c0_25], %43 {strides = array<i32>} : memref<2x8xf32, #tpu.memory_space<vmem>>, vector<2x8xf32>,
    } else {
    }
    return
  }
  func.func @transform_0(%arg0: i32) -> (i32, i32) {
    %c0_i32 = arith.constant 0 : i32
    %c0_i32_0 = arith.constant 0 : i32
    %c0_i32_1 = arith.constant 0 : i32
    return %c0_i32, %c0_i32_0 : i32, i32
  }
  func.func @transform_1(%arg0: i32) -> (i32, i32) {
    %c0_i32 = arith.constant 0 : i32
    %c0_i32_0 = arith.constant 0 : i32
    return %c0_i32, %arg0 : i32, i32
  }
  func.func @transform_2(%arg0: i32) -> (i32, i32) {
    %c0_i32 = arith.constant 0 : i32
    %c0_i32_0 = arith.constant 0 : i32
    return %c0_i32, %arg0 : i32, i32
  }
  func.func @transform_3(%arg0: i32) -> (i32, i32) {
    %c0_i32 = arith.constant 0 : i32
    %c0_i32_0 = arith.constant 0 : i32
    %c0_i32_1 = arith.constant 0 : i32
    return %c0_i32, %c0_i32_0 : i32, i32
  }
  func.func @transform_4(%arg0: i32) -> (i32, i32) {
    %c0_i32 = arith.constant 0 : i32
    %c0_i32_0 = arith.constant 0 : i32
    %c0_i32_1 = arith.constant 0 : i32
    return %c0_i32, %c0_i32_0 : i32, i32
  }
  func.func @transform_5(%arg0: i32) -> (i32, i32) {
    %c0_i32 = arith.constant 0 : i32
    %c0_i32_0 = arith.constant 0 : i32
    %c0_i32_1 = arith.constant 0 : i32
    return %c0_i32, %c0_i32_0 : i32, i32
  }
}

</mosaic_0001>

<bundles_post_ra>
// kernel: tpu_custom_call.1
= control target key start
LH: loop header
LB: loop body
LE: loop exit
PB: predicated region body
PF: predicated region fallthrough
CT: control target
= control target key end

     0   :  { %v29_v0 = vlaneseq  ;;  %s592_s0 = inlined_call_operand.vmem [shape: f32[1,16], index: 0, kind: input, shape index: {}]   ;;  %s593_s1 = inlined_call_operand.vmem [shape: s32[1,512], index: 1, kind: input, shape index: {}]   ;;  %s594_s2 = inlined_call_operand.vmem [shape: s32[1,512], index: 2, kind: input, shape index: {}]   ;;  %s595_s3 = inlined_call_operand.vmem [shape: f32[16,8], index: 3, kind: input, shape index: {}]   ;;  %s596_s4 = inlined_call_operand.vmem [shape: f32[1,8], index: 4, kind: input, shape index: {}]   ;;  %s597_s5 = inlined_call_operand.hbm [shape: f32[2,8], index: 5, kind: output, shape index: {}]  }
   0x1   :  { %10 = vsyncpa [#allocation4], 0  ;;  %v77_v2 = vld [vmem:[%s593_s1] sm:$0xf]  ;;  %v497_v16 = vmov 1.0|1.0  }
   0x2   :  { %v532_v1 = vshrl.u32 %v29_v0, 7  ;;  %v32_v3 = vld [vmem:[%s594_s2] sm:$0xf]  ;;  %v498_v18 = vmov 0.0   ;;  %v499_v19 = vmov 0.0|0.0   ;;  %v303_v21 = vld [vmem:[%s595_s3 + $0x8] sm:$0xff] }
   0x3   :  { %v302_v20 = vld [vmem:[%s595_s3] sm:$0xff]  ;;  %s501_s27 = smov [#allocation3]  }
   0x4   :  { %v31_v4 = vadd.s32 8, %v532_v1  ;;  %v39_v5 = vsub.s32 1, %v532_v1  ;;  %v47_v6 = vsub.s32 3, %v532_v1  ;;  %v544_v7 = vsub.s32 0, %v532_v1  ;;  %v226_v49 = vld [vmem:[%s592_s0] sm:$0x1] }
   0x5   :  { %v43_v8 = vsub.s32 2, %v532_v1  ;;  %v464_v22 = vpack.c.bf16 %v303_v21, %v302_v20  ;;  %v304_v55 = vld [vmem:[%s596_s4] sm:$0x1]  ;;  %s398_s0 = sshll.u32 %s501_s27, 4  ;;  %s399_s0 = int_to_ptr.vmem [resolvable:$true] %s398_s0 }
   0x6   :  { %v85_v9 = vrot.slane %v77_v2, %v39_v5  ;;  %v93_v10 = vrot.slane %v77_v2, %v47_v6  ;;  %v81_v11 = vrot.slane %v77_v2, %v544_v7  ;;  %v40_v12 = vrot.slane %v32_v3, %v39_v5  ;;  %s473_s28 = scalar_lea.vmem %s399_s0, 32  ;;  %p478_p1 = scmp.lt.s32.totalorder %s399_s0, %s399_s0 }
   0x7   :  { %v89_v13 = vrot.slane %v77_v2, %v43_v8  ;;  %v48_v14 = vrot.slane %v32_v3, %v47_v6  ;;  %v36_v15 = vrot.slane %v32_v3, %v544_v7  ;;  %v44_v17 = vrot.slane %v32_v3, %v43_v8  ;;  %p474_p0 = scmp.ne.s32.totalorder %s399_s0, %s473_s28  ;;  %p479_p2 = scmp.lt.s32.totalorder %s473_s28, %s473_s28 }
   0x8   :  { %vm95_vm0 = vcmp.eq.s32.totalorder %v532_v1, %v85_v9  ;;  %vm99_vm1 = vcmp.eq.s32.totalorder %v31_v4, %v85_v9  ;;  %vm97_vm2 = vcmp.eq.s32.totalorder %v532_v1, %v93_v10  ;;  %vm101_vm3 = vcmp.eq.s32.totalorder %v31_v4, %v93_v10 }
   0x9   :  { %vm422_vm4 = vmpackc.low %vm99_vm1, %vm95_vm0  ;;  %vm94_vm5 = vcmp.eq.s32.totalorder %v532_v1, %v81_v11  ;;  %vm98_vm6 = vcmp.eq.s32.totalorder %v31_v4, %v81_v11  ;;  %vm96_vm7 = vcmp.eq.s32.totalorder %v532_v1, %v89_v13  ;;  %vm100_vm8 = vcmp.eq.s32.totalorder %v31_v4, %v89_v13  ;;  %p480_p3 = por %p479_p2, %p478_p1 }
   0xa   :  { %423 = vmatprep.subr.msk.bf16.mxu0 %vm422_vm4, %v497_v16  ;;  %vm430_vm9 = vmpackc.low %vm101_vm3, %vm97_vm2  ;;  %vm50_vm10 = vcmp.eq.s32.totalorder %v532_v1, %v40_v12  ;;  %vm54_vm11 = vcmp.eq.s32.totalorder %v31_v4, %v40_v12  ;;  %vm52_vm13 = vcmp.eq.s32.totalorder %v532_v1, %v48_v14  ;;  %vm56_vm14 = vcmp.eq.s32.totalorder %v31_v4, %v48_v14 }
   0xb   :  { %431 = vmatprep.subr.msk.bf16.mxu1 %vm430_vm9, %v497_v16  ;;  %vm424_vm12 = vmpackc.low %vm98_vm6, %vm94_vm5  ;;  %vm49_vm1 = vcmp.eq.s32.totalorder %v532_v1, %v36_v15  ;;  %vm53_vm4 = vcmp.eq.s32.totalorder %v31_v4, %v36_v15  ;;  %vm51_vm3 = vcmp.eq.s32.totalorder %v532_v1, %v44_v17  ;;  %vm55_vm9 = vcmp.eq.s32.totalorder %v31_v4, %v44_v17  ;;  %p481_p4 = pnand %p480_p3, %p474_p0 }
   0xc   :  { %425 = vmatpush1.bf16.xpose.msk.msra.mxu0 %vm424_vm12, %v497_v16  ;;  %vm432_vm15 = vmpackc.low %vm100_vm8, %vm96_vm7  ;;  %vm26_vm12 = vcmask 130048   ;;  %vm500_vm7 = vmmov 0   ;;  %v387_v58 = vrot.slane %v304_v55, %v544_v7  ;;  %vm378_vm8 = vcmp.eq.s32.totalorder %v532_v1, 0 }
   0xd   :  { %433 = vmatpush1.bf16.xpose.msk.msra.mxu1 %vm432_vm15, %v497_v16  ;;  %vm426_vm0 = vmpackc.low %vm54_vm11, %vm50_vm10  ;;  %27 = vst.msk [vmem:[#allocation2] sm:$0xff] %vm26_vm12, %v498_v18  ;;  %460 = vmatprep.subr.bf16.mxu0 %v499_v19  ;;  %vm390_vm10 = vcmask 58368  }
   0xe   :  { %427 = vmatprep.mubr.msk.bf16.mxu0 %vm426_vm0, %v497_v16  ;;  %vm434_vm2 = vmpackc.low %vm56_vm14, %vm52_vm13  ;;  %28 = vst.msk [vmem:[#allocation2 + $0x8] sm:$0xff] %vm26_vm12, %v498_v18  ;;  %463 = vmatprep.subr.bf16.mxu1 %v499_v19 }
   0xf   :  { %435 = vmatprep.mubr.msk.bf16.mxu1 %vm434_vm2, %v497_v16  ;;  %vm428_vm5 = vmpackc.low %vm53_vm4, %vm49_vm1 }
  0x10   :  { %vm436_vm6 = vmpackc.low %vm55_vm9, %vm51_vm3 }
  0x13   :  { %429 = vmatmul.mubr.msk.bf16.vlgmr.msra.gmra.mrb[0].mxu0 %vm428_vm5, %v497_v16 }
  0x14   :  { %437 = vmatmul.mubr.msk.bf16.vlgmr.msra.gmra.mrb[0].mxu1 %vm436_vm6, %v497_v16  ;;  %450 = vmatprep.mubr.msk.f32.mxu0 %vm500_vm7, %v498_v18  ;;  %v122_v24 = vld [vmem:[#allocation2] sm:$0xff] }
  0x15   :  { %457 = vmatprep.mubr.msk.f32.mxu1 %vm500_vm7, %v498_v18  ;;  %465 = vmatpush3.bf16.msra.mxu1 %v464_v22  ;;  %v123_v30 = vld [vmem:[#allocation2 + $0x8] sm:$0xff] }
  0xe6   :  { %v158_v23 = vpop.f32.mrb[0].mxu0 }
  0xe7   :  { %v199_v25 = vpop.f32.mrb[0].mxu1  ;;  %v160_v26 = vpop.f32.mrb[1].mxu0 }
  0xe8   :  { %v200_v27 = vadd.f32 %v199_v25, %v158_v23  ;;  %v201_v28 = vpop.f32.mrb[1].mxu1  ;;  %v161_v29 = vpop.f32.mrb[2].mxu0 }
  0xe9   :  { %v202_v31 = vpop.f32.mrb[2].mxu1  ;;  %v163_v32 = vpop.f32.mrb[3].mxu0 }
  0xea   :  { %v206_v33 = vadd.f32 %v200_v27, %v122_v24  ;;  %v203_v34 = vadd.f32 %v202_v31, %v161_v29  ;;  %v204_v35 = vpop.f32.mrb[3].mxu1 }
  0xec   :  { %209 = vst.msk [vmem:[#allocation2] sm:$0xff] %vm26_vm12, %v206_v33  ;;  %v207_v36 = vadd.f32 %v203_v34, %v123_v30 }
  0xee   :  { %210 = vst.msk [vmem:[#allocation2 + $0x8] sm:$0xff] %vm26_vm12, %v207_v36 }
  0xf3   :  { %v214_v37 = vld [vmem:[#allocation2] sm:$0xff] }
  0xf4   :  { %v216_v39 = vsel %vm26_vm12, %v214_v37, 0.0 }
  0xf5   :  { %v215_v38 = vld [vmem:[#allocation2 + $0x8] sm:$0xff] }
  0xf6   :  { %v217_v40 = vsel %vm26_vm12, %v215_v38, 0.0  ;;  %v461_v41 = vpack.c.bf16 %v215_v38, %v214_v37 }
  0xf7   :  { %v218_v42 = vadd.f32 %v217_v40, %v216_v39 }
  0xf8   :  { %462 = vmatpush3.bf16.msra.mxu0 %v461_v41 }
  0xf9   :  { %v219_v43 = vrot.slane %v218_v42, 4 }
  0xfb   :  { %v220_v44 = vadd.f32 %v219_v43, %v218_v42 }
  0xfd   :  { %v221_v45 = vrot.slane %v220_v44, 2 }
  0xff   :  { %v222_v46 = vadd.f32 %v221_v45, %v220_v44 }
 0x101   :  { %v223_v47 = vrot.slane %v222_v46, 1 }
 0x103   :  { %v224_v48 = vadd.f32 %v223_v47, %v222_v46 }
 0x105   :  { %471 = vrsqrt.f32 %v224_v48 }
 0x10f   :  { %v472_v50 = vpop.eup %471 }
 0x110   :  { %v227_v51 = vmul.f32 %v472_v50, %v226_v49 }
 0x112   :  { %451 = vmatmul.mubr.msk.f32.vlgmr.msra.gmra.mrb[4].mxu0 %vm26_vm12, %v227_v51 }
 0x1e5   :  { %v297_v52 = vpop.f32.mrb[4].mxu0 }
 0x1e6   :  { %v301_v53 = vmul.f32 %v472_v50, %v297_v52  ;;  %v452_v54 = vpop.f32.mrb[5].mxu0 }
 0x1e8   :  { %458 = vmatmul.mubr.msk.f32.vlgmr.msra.gmra.mrb[4].mxu1 %vm26_vm12, %v301_v53 }
 0x2bb   :  { %v374_v56 = vpop.f32.mrb[4].mxu1 }
 0x2bc   :  { %v375_v57 = vadd.f32 %v374_v56, %v304_v55  ;;  %v459_v59 = vpop.f32.mrb[5].mxu1 }
 0x2be   :  { %v382_v60 = vrot.slane %v375_v57, %v544_v7 }
 0x2c0   :  { %v389_v61 = vsel %vm378_vm8, %v382_v60, %v387_v58 }
 0x2c1   :  { %391 = vst.msk [vmem:[#allocation3] sm:$0x3] %vm390_vm10, %v389_v61 }
 0x2c2   :  { %484 = shalt.err (!%p481_p4)
}
 0x2c3   :  { %s485_s30 = scalar_lea.hbm %s597_s5, 32 }
 0x2c4   :  { %p486_p5 = scmp.ne.s32.totalorder %s597_s5, %s485_s30  ;;  %p489_p6 = scmp.lt.u32.totalorder %s485_s30, %s597_s5 }
 0x2c6   :  { %p491_p7 = pnand %p489_p6, %p486_p5 }
 0x2c8   :  { %494 = shalt.err (!%p491_p7)
}
 0x2c9   :  { %401 = dma.vmem_to_hbm [thread:$0]  %s399_s0, 32, %s597_s5, [#allocation4]  }
 0x2ca   :  { %495 = dma.done.wait [#allocation4], 32  }
 0x2cb   :  { %496 = vsyncadd [#allocation4], 4294967264 }
 0x2cc   :  { %405 = vsyncpa [#allocation4], 1 }

</bundles_post_ra>
